<compile_context>
chip_gen: v7x
topology: tpu7x:2x2x1
jax: 0.10.0
libtpu: 0.0.40
codegen_flags: <defaults>
</compile_context>

<pallas_src>
from functools import partial

import jax
import jax.numpy as jnp
from jax.experimental import pallas as pl
from jax.experimental.pallas import tpu as pltpu


V_TILE = 512  # vocab tile (multiple of 256 for v6e MXU, of 128 for v5e lanes)


def _round_up(x, m):
    return ((x + m - 1) // m) * m


def luong_decoder_kernel(
    xh_ref,     # (Bp, 2H)  f32   [embedded | last_hidden]  (dropout = identity, eval)
    h_ref,      # (Bp, H)   f32   last hidden state (layer 0)
    enc_ref,    # (Bp, L, H) f32  encoder outputs, batch-major
    w_gru_ref,  # (2H, 4H)  bf16  fused GRU weight, columns [r | z | n_x | n_h]
    b_gru_ref,  # (1, 4H)   f32   [b_ir+b_hr | b_iz+b_hz | b_in | b_hn]
    wc1_ref,    # (H, H)    bf16  concat-linear weight (rnn_output half), transposed
    wc2_ref,    # (H, H)    bf16  concat-linear weight (context half), transposed
    bc_ref,     # (1, H)    f32
    wo_ref,     # (H, TV)   bf16  output-linear weight tile (streamed over vocab)
    bo_ref,     # (1, TV)   f32
    out_ref,    # (Bp, TV)  f32   logits tile
    hid_ref,    # (Bp, H)   f32   new hidden (== rnn_output for 1-layer GRU)
    attn_ref,   # (Bp, L)   f32   attention weights
    ctx_ref,    # (Bp, H)   f32   context vector
    concat_sc,  # (Bp, H)   f32   scratch: tanh(concat(...)) persisted across vocab tiles
):
    H = h_ref.shape[1]

    # GRU cell + attention + concat-linear run once (first vocab tile); results live
    # in VMEM (outputs with constant index maps + scratch) for the remaining tiles.
    @pl.when(pl.program_id(0) == 0)
    def _():
        mxu_dt = w_gru_ref.dtype
        h = h_ref[...]

        # ---- GRU cell: one fused (Bp,2H)x(2H,4H) MXU matmul (PyTorch gate order) ----
        g = jnp.dot(xh_ref[...].astype(mxu_dt), w_gru_ref[...],
                    preferred_element_type=jnp.float32) + b_gru_ref[...]
        r = jax.nn.sigmoid(g[:, 0 * H:1 * H])
        z = jax.nn.sigmoid(g[:, 1 * H:2 * H])
        n = jnp.tanh(g[:, 2 * H:3 * H] + r * g[:, 3 * H:4 * H])
        h_new = (1.0 - z) * n + z * h                                # (Bp, H)

        # ---- dot attention in (B, L, H) layout; softmax over L on the lane axis ----
        enc = enc_ref[...]                                           # (Bp, L, H)
        scores = jnp.sum(h_new[:, None, :] * enc, axis=-1)           # (Bp, L)
        m = jnp.max(scores, axis=-1, keepdims=True)
        e = jnp.exp(scores - m)
        denom = jnp.sum(e, axis=-1, keepdims=True)
        attn = e * pl.reciprocal(denom, approx=True)                 # (Bp, L)
        context = jnp.sum(attn[:, :, None] * enc, axis=1)            # (Bp, H)

        # ---- concat linear + tanh (weight split avoids an in-kernel concat) ----
        concat_out = jnp.tanh(
            jnp.dot(h_new.astype(mxu_dt), wc1_ref[...],
                    preferred_element_type=jnp.float32)
            + jnp.dot(context.astype(mxu_dt), wc2_ref[...],
                      preferred_element_type=jnp.float32)
            + bc_ref[...]
        )

        hid_ref[...] = h_new
        attn_ref[...] = attn
        ctx_ref[...] = context
        concat_sc[...] = concat_out

    # ---- output projection for this vocab tile (lane-dense, streamed weight) ----
    co = concat_sc[...]
    out_ref[...] = (
        jnp.dot(co.astype(wo_ref.dtype), wo_ref[...],
                preferred_element_type=jnp.float32)
        + bo_ref[...]
    )


def prepare_params(params, mxu_dtype=jnp.bfloat16):
    """One-time param prep: fuse/transpose GRU + linear weights (in, out) layout,
    cast MXU operands to bf16, pad the output projection to a lane-dense vocab."""
    H = params["w_hh"].shape[1]
    V = params["w_out"].shape[0]
    w_ih, w_hh = params["w_ih"], params["w_hh"]       # (3H, H), rows [r; z; n]
    zeros = jnp.zeros((H, H), jnp.float32)

    # Fused GRU weight: rows 0:H act on x, rows H:2H act on h.
    top = jnp.concatenate([w_ih[0:H].T, w_ih[H:2 * H].T, w_ih[2 * H:3 * H].T, zeros], axis=1)
    bot = jnp.concatenate([w_hh[0:H].T, w_hh[H:2 * H].T, zeros, w_hh[2 * H:3 * H].T], axis=1)
    w_gru = jnp.concatenate([top, bot], axis=0).astype(mxu_dtype)          # (2H, 4H)
    b_gru = jnp.concatenate([
        params["b_ih"][0:H] + params["b_hh"][0:H],
        params["b_ih"][H:2 * H] + params["b_hh"][H:2 * H],
        params["b_ih"][2 * H:3 * H],
        params["b_hh"][2 * H:3 * H],
    ], axis=0)[None, :].astype(jnp.float32)                                 # (1, 4H)

    # Concat layer weight is laid out as [rnn_output | context] columns (PyTorch cat order).
    wc1_t = params["w_concat"][:, :H].T.astype(mxu_dtype)                   # (H, H)
    wc2_t = params["w_concat"][:, H:].T.astype(mxu_dtype)                   # (H, H)
    b_c = params["b_concat"][None, :].astype(jnp.float32)                   # (1, H)

    # Output projection padded to a multiple of 128 (and of V_TILE when tiled).
    v_pad = _round_up(V, 128) if V <= V_TILE else _round_up(V, V_TILE)
    wo_t = jnp.zeros((H, v_pad), jnp.float32).at[:, :V].set(params["w_out"].T)
    b_o = jnp.zeros((1, v_pad), jnp.float32).at[:, :V].set(params["b_out"][None, :])

    return {
        "emb_table": params["emb_table"].astype(jnp.float32),
        "w_gru": w_gru, "b_gru": b_gru,
        "wc1_t": wc1_t, "wc2_t": wc2_t, "b_c": b_c,
        "wo_t": wo_t.astype(mxu_dtype), "b_o": b_o,
    }


@partial(jax.jit, static_argnames=("out_size",))
def _decoder_step_impl(input_seq, last_hidden, encoder_outputs, prepped, *, out_size):
    tokens = input_seq[0]                                  # (B,)
    B = tokens.shape[0]
    L, _, H = encoder_outputs.shape
    V_pad = prepped["wo_t"].shape[1]
    TV = V_pad if V_pad <= V_TILE else V_TILE
    n_vt = V_pad // TV
    B_pad = _round_up(max(B, 8), 8)                        # >= 8 sublanes

    # Glue: embedding gather + eval-mode dropout (identity) + batch-major layout.
    # TODO(synk): training-mode embedding dropout (nn.Dropout(p)) not implemented.
    emb = jnp.take(prepped["emb_table"], tokens, axis=0)               # (B, H)
    h0 = last_hidden[0].astype(jnp.float32)                            # (B, H)
    enc = jnp.transpose(encoder_outputs, (1, 0, 2)).astype(jnp.float32)  # (B, L, H)

    pad_b = lambda a: jnp.pad(a, ((0, B_pad - B),) + ((0, 0),) * (a.ndim - 1))
    xh = pad_b(jnp.concatenate([emb, h0], axis=1))         # (Bp, 2H)
    h0p = pad_b(h0)                                        # (Bp, H)
    encp = pad_b(enc)                                      # (Bp, L, H)

    const2 = lambda j: (0, 0)
    const3 = lambda j: (0, 0, 0)

    grid_spec = pltpu.PrefetchScalarGridSpec(
        num_scalar_prefetch=0,
        grid=(n_vt,),
        in_specs=[
            pl.BlockSpec((B_pad, 2 * H), const2),          # xh          (resident)
            pl.BlockSpec((B_pad, H), const2),              # h0          (resident)
            pl.BlockSpec((B_pad, L, H), const3),           # encoder out (resident)
            pl.BlockSpec((2 * H, 4 * H), const2),          # fused GRU W (resident)
            pl.BlockSpec((1, 4 * H), const2),
            pl.BlockSpec((H, H), const2),                  # concat W halves
            pl.BlockSpec((H, H), const2),
            pl.BlockSpec((1, H), const2),
            pl.BlockSpec((H, TV), lambda j: (0, j)),       # W_out tile  (streamed)
            pl.BlockSpec((1, TV), lambda j: (0, j)),
        ],
        out_specs=[
            pl.BlockSpec((B_pad, TV), lambda j: (0, j)),   # logits tile (lane-dense)
            pl.BlockSpec((B_pad, H), const2),              # hidden
            pl.BlockSpec((B_pad, L), const2),              # attn weights
            pl.BlockSpec((B_pad, H), const2),              # context
        ],
        scratch_shapes=[pltpu.VMEM((B_pad, H), jnp.float32)],
    )

    out_shapes = (
        jax.ShapeDtypeStruct((B_pad, V_pad), jnp.float32),
        jax.ShapeDtypeStruct((B_pad, H), jnp.float32),
        jax.ShapeDtypeStruct((B_pad, L), jnp.float32),
        jax.ShapeDtypeStruct((B_pad, H), jnp.float32),
    )

    logits_p, hid_p, attn_p, ctx_p = pl.pallas_call(
        luong_decoder_kernel,
        out_shape=out_shapes,
        grid_spec=grid_spec,
        compiler_params=pltpu.CompilerParams(dimension_semantics=("arbitrary",)),
    )(
        xh, h0p, encp,
        prepped["w_gru"], prepped["b_gru"],
        prepped["wc1_t"], prepped["wc2_t"], prepped["b_c"],
        prepped["wo_t"], prepped["b_o"],
    )

    # Restore PyTorch output shapes (strip batch/vocab padding).
    output = logits_p[:B, :out_size]                       # (B, V)
    hidden = hid_p[:B][None, :, :]                         # (1, B, H)
    attn_weights = attn_p[:B][:, None, :]                  # (B, 1, L)
    rnn_output = hid_p[:B]                                 # == hidden[0] for 1-layer GRU
    context = ctx_p[:B]                                    # (B, H)
    return output, hidden, attn_weights, rnn_output, context


def luong_attn_decoder_step(input_seq, last_hidden, encoder_outputs, prepped, output_size):
    """input_seq: (1, B) int32, last_hidden: (1, B, H), encoder_outputs: (L, B, H)."""
    return _decoder_step_impl(input_seq, last_hidden, encoder_outputs, prepped,
                              out_size=output_size)


def make_params(key, vocab_size, hidden_size, output_size):
    """Deterministic parameter init (PyTorch-style uniform(+-1/sqrt(H)))."""
    H = hidden_size
    k = 1.0 / jnp.sqrt(jnp.float32(H))
    keys = jax.random.split(key, 10)
    u = lambda kk, shape: jax.random.uniform(kk, shape, jnp.float32, -k, k)
    return {
        "emb_table": jax.random.normal(keys[0], (vocab_size, H), jnp.float32),
        "w_ih": u(keys[1], (3 * H, H)),
        "w_hh": u(keys[2], (3 * H, H)),
        "b_ih": u(keys[3], (3 * H,)),
        "b_hh": u(keys[4], (3 * H,)),
        "w_concat": u(keys[5], (H, 2 * H)),
        "b_concat": u(keys[6], (H,)),
        "w_out": u(keys[7], (output_size, H)),
        "b_out": u(keys[8], (output_size,)),
    }


if __name__ == "__main__":
    B, L, H, V = 2, 8, 32, 64   # batch, encoder seq len, hidden, vocab/output size

    key = jax.random.PRNGKey(0)
    k_params, k_tok, k_hid, k_enc = jax.random.split(key, 4)

    params = make_params(k_params, vocab_size=V, hidden_size=H, output_size=V)
    prepped = prepare_params(params)                                         # once

    input_seq = jax.random.randint(k_tok, (1, B), 0, V, dtype=jnp.int32)     # (1, B)
    last_hidden = jax.random.normal(k_hid, (1, B, H), jnp.float32)           # (1, B, H)
    encoder_outputs = jax.random.normal(k_enc, (L, B, H), jnp.float32)       # (L, B, H)

    outs = luong_attn_decoder_step(input_seq, last_hidden, encoder_outputs, prepped, V)
    outs = jax.block_until_ready(outs)

    output, hidden, attn_weights, rnn_output, context = outs
    assert output.shape == (B, V)
    assert hidden.shape == (1, B, H)
    assert attn_weights.shape == (B, 1, L)
    assert rnn_output.shape == (B, H)
    assert context.shape == (B, H)
    print("KERNEL_OK")
</pallas_src>

<mosaic_0001>
module attributes {stable_mosaic.version = 11 : i64} {
  func.func @luong_decoder_kernel(%arg0: i32, %arg1: memref<8x64xf32, #tpu.memory_space<vmem>>, %arg2: memref<8x32xf32, #tpu.memory_space<vmem>>, %arg3: memref<8x8x32xf32, #tpu.memory_space<vmem>>, %arg4: memref<64x128xbf16, #tpu.memory_space<vmem>>, %arg5: memref<1x128xf32, #tpu.memory_space<vmem>>, %arg6: memref<32x32xbf16, #tpu.memory_space<vmem>>, %arg7: memref<32x32xbf16, #tpu.memory_space<vmem>>, %arg8: memref<1x32xf32, #tpu.memory_space<vmem>>, %arg9: memref<32x128xbf16, #tpu.memory_space<vmem>>, %arg10: memref<1x128xf32, #tpu.memory_space<vmem>>, %arg11: memref<8x128xf32, #tpu.memory_space<vmem>>, %arg12: memref<8x32xf32, #tpu.memory_space<vmem>>, %arg13: memref<8x8xf32, #tpu.memory_space<vmem>>, %arg14: memref<8x32xf32, #tpu.memory_space<vmem>>, %arg15: memref<8x32xf32, #tpu.memory_space<vmem>>) attributes {dimension_semantics = [#tpu.dimension_semantics<arbitrary>], iteration_bounds = array<i64: 1>, scalar_prefetch = 0 : i64, scratch_operands = 1 : i64, tpu.core_type = #tpu.core_type<tc>, window_params = [{pipeline_mode = #tpu.pipeline_mode<synchronous>, transform_indices = @transform_0, window_bounds = array<i64: 8, 64>}, {pipeline_mode = #tpu.pipeline_mode<synchronous>, transform_indices = @transform_1, window_bounds = array<i64: 8, 32>}, {pipeline_mode = #tpu.pipeline_mode<synchronous>, transform_indices = @transform_2, window_bounds = array<i64: 8, 8, 32>}, {pipeline_mode = #tpu.pipeline_mode<synchronous>, transform_indices = @transform_3, window_bounds = array<i64: 64, 128>}, {pipeline_mode = #tpu.pipeline_mode<synchronous>, transform_indices = @transform_4, window_bounds = array<i64: 1, 128>}, {pipeline_mode = #tpu.pipeline_mode<synchronous>, transform_indices = @transform_5, window_bounds = array<i64: 32, 32>}, {pipeline_mode = #tpu.pipeline_mode<synchronous>, transform_indices = @transform_6, window_bounds = array<i64: 32, 32>}, {pipeline_mode = #tpu.pipeline_mode<synchronous>, transform_indices = @transform_7, window_bounds = array<i64: 1, 32>}, {transform_indices = @transform_8, window_bounds = array<i64: 32, 128>}, {transform_indices = @transform_9, window_bounds = array<i64: 1, 128>}, {transform_indices = @transform_10, window_bounds = array<i64: 8, 128>}, {pipeline_mode = #tpu.pipeline_mode<synchronous>, transform_indices = @transform_11, window_bounds = array<i64: 8, 32>}, {pipeline_mode = #tpu.pipeline_mode<synchronous>, transform_indices = @transform_12, window_bounds = array<i64: 8, 8>}, {pipeline_mode = #tpu.pipeline_mode<synchronous>, transform_indices = @transform_13, window_bounds = array<i64: 8, 32>}]} {
    %c0_i32 = arith.constant 0 : i32
    %0 = arith.cmpi eq, %arg0, %c0_i32 : i32
    %1 = arith.extui %0 : i1 to i32
    %c0_i32_0 = arith.constant 0 : i32
    %2 = arith.cmpi ne, %1, %c0_i32_0 : i32
    scf.if %2 {
      %c0_8 = arith.constant 0 : index
      %c0_9 = arith.constant 0 : index
      %11 = vector.load %arg2[%c0_8, %c0_9] : memref<8x32xf32, #tpu.memory_space<vmem>>, vector<8x32xf32>
      %c0_10 = arith.constant 0 : index
      %c0_11 = arith.constant 0 : index
      %12 = vector.load %arg1[%c0_10, %c0_11] : memref<8x64xf32, #tpu.memory_space<vmem>>, vector<8x64xf32>
      %13 = arith.truncf %12 : vector<8x64xf32> to vector<8x64xbf16>
      %c0_12 = arith.constant 0 : index
      %c0_13 = arith.constant 0 : index
      %14 = vector.load %arg4[%c0_12, %c0_13] : memref<64x128xbf16, #tpu.memory_space<vmem>>, vector<64x128xbf16>
      %cst_14 = arith.constant dense<0.000000e+00> : vector<8x128xf32>
      %15 = tpu.matmul %13, %14, %cst_14 {dimension_numbers = #tpu.dot_dimension_numbers<[1], [0], [0], [1], [0, 0, 1, 1], [], []>} : vector<8x64xbf16>, vector<64x128xbf16>, vector<8x128xf32> -> vector<8x128xf32>
      %c0_15 = arith.constant 0 : index
      %c0_16 = arith.constant 0 : index
      %16 = vector.load %arg5[%c0_15, %c0_16] : memref<1x128xf32, #tpu.memory_space<vmem>>, vector<1x128xf32>
      %17 = vector.broadcast %16 : vector<1x128xf32> to vector<8x128xf32>
      %18 = arith.addf %15, %17 : vector<8x128xf32>
      %19 = vector.extract_strided_slice %18 {offsets = [0, 0], sizes = [8, 32], strides = [1, 1]} : vector<8x128xf32> to vector<8x32xf32>
      %20 = arith.negf %19 : vector<8x32xf32>
      %21 = math.exp %20 : vector<8x32xf32>
      %cst_17 = arith.constant 1.000000e+00 : f32
      %22 = vector.broadcast %cst_17 : f32 to vector<8x32xf32>
      %23 = arith.addf %22, %21 : vector<8x32xf32>
      %24 = arith.divf %22, %23 : vector<8x32xf32>
      %25 = vector.extract_strided_slice %18 {offsets = [0, 32], sizes = [8, 32], strides = [1, 1]} : vector<8x128xf32> to vector<8x32xf32>
      %26 = arith.negf %25 : vector<8x32xf32>
      %27 = math.exp %26 : vector<8x32xf32>
      %cst_18 = arith.constant 1.000000e+00 : f32
      %28 = vector.broadcast %cst_18 : f32 to vector<8x32xf32>
      %29 = arith.addf %28, %27 : vector<8x32xf32>
      %30 = arith.divf %28, %29 : vector<8x32xf32>
      %31 = vector.extract_strided_slice %18 {offsets = [0, 64], sizes = [8, 32], strides = [1, 1]} : vector<8x128xf32> to vector<8x32xf32>
      %32 = vector.extract_strided_slice %18 {offsets = [0, 96], sizes = [8, 32], strides = [1, 1]} : vector<8x128xf32> to vector<8x32xf32>
      %33 = arith.mulf %24, %32 : vector<8x32xf32>
      %34 = arith.addf %31, %33 : vector<8x32xf32>
      %35 = math.tanh %34 : vector<8x32xf32>
      %cst_19 = arith.constant 1.000000e+00 : f32
      %36 = vector.broadcast %cst_19 : f32 to vector<8x32xf32>
      %37 = arith.subf %36, %30 : vector<8x32xf32>
      %38 = arith.mulf %37, %35 : vector<8x32xf32>
      %39 = arith.mulf %30, %11 : vector<8x32xf32>
      %40 = arith.addf %38, %39 : vector<8x32xf32>
      %c0_20 = arith.constant 0 : index
      %c0_21 = arith.constant 0 : index
      %c0_22 = arith.constant 0 : index
      %41 = vector.load %arg3[%c0_20, %c0_21, %c0_22] : memref<8x8x32xf32, #tpu.memory_space<vmem>>, vector<8x8x32xf32>
      %42 = vector.shape_cast %40 : vector<8x32xf32> to vector<8x1x32xf32>
      %43 = vector.broadcast %42 : vector<8x1x32xf32> to vector<8x8x32xf32>
      %44 = arith.mulf %43, %41 : vector<8x8x32xf32>
      %cst_23 = arith.constant dense<0.000000e+00> : vector<8x8xf32>
      %45 = vector.multi_reduction <add>, %44, %cst_23 [2] : vector<8x8x32xf32> to vector<8x8xf32>
      %cst_24 = arith.constant dense<0xFF800000> : vector<8xf32>
      %46 = vector.multi_reduction <maximumf>, %45, %cst_24 [1] : vector<8x8xf32> to vector<8xf32>
      %47 = vector.shape_cast %46 : vector<8xf32> to vector<8x1xf32>
      %48 = vector.broadcast %47 : vector<8x1xf32> to vector<8x8xf32>
      %49 = arith.subf %45, %48 : vector<8x8xf32>
      %50 = math.exp %49 : vector<8x8xf32>
      %cst_25 = arith.constant dense<0.000000e+00> : vector<8xf32>
      %51 = vector.multi_reduction <add>, %50, %cst_25 [1] : vector<8x8xf32> to vector<8xf32>
      %52 = vector.shape_cast %51 : vector<8xf32> to vector<8x1xf32>
      %53 = tpu.reciprocal %52 {approx = true} : vector<8x1xf32> -> vector<8x1xf32>
      %54 = vector.broadcast %53 : vector<8x1xf32> to vector<8x8xf32>
      %55 = arith.mulf %50, %54 : vector<8x8xf32>
      %56 = vector.shape_cast %55 : vector<8x8xf32> to vector<8x8x1xf32>
      %57 = vector.broadcast %56 : vector<8x8x1xf32> to vector<8x8x32xf32>
      %58 = arith.mulf %57, %41 : vector<8x8x32xf32>
      %cst_26 = arith.constant dense<0.000000e+00> : vector<8x32xf32>
      %59 = vector.multi_reduction <add>, %58, %cst_26 [1] : vector<8x8x32xf32> to vector<8x32xf32>
      %60 = arith.truncf %40 : vector<8x32xf32> to vector<8x32xbf16>
      %c0_27 = arith.constant 0 : index
      %c0_28 = arith.constant 0 : index
      %61 = vector.load %arg6[%c0_27, %c0_28] : memref<32x32xbf16, #tpu.memory_space<vmem>>, vector<32x32xbf16>
      %cst_29 = arith.constant dense<0.000000e+00> : vector<8x32xf32>
      %62 = tpu.matmul %60, %61, %cst_29 {dimension_numbers = #tpu.dot_dimension_numbers<[1], [0], [0], [1], [0, 0, 1, 1], [], []>} : vector<8x32xbf16>, vector<32x32xbf16>, vector<8x32xf32> -> vector<8x32xf32>
      %63 = arith.truncf %59 : vector<8x32xf32> to vector<8x32xbf16>
      %c0_30 = arith.constant 0 : index
      %c0_31 = arith.constant 0 : index
      %64 = vector.load %arg7[%c0_30, %c0_31] : memref<32x32xbf16, #tpu.memory_space<vmem>>, vector<32x32xbf16>
      %cst_32 = arith.constant dense<0.000000e+00> : vector<8x32xf32>
      %65 = tpu.matmul %63, %64, %cst_32 {dimension_numbers = #tpu.dot_dimension_numbers<[1], [0], [0], [1], [0, 0, 1, 1], [], []>} : vector<8x32xbf16>, vector<32x32xbf16>, vector<8x32xf32> -> vector<8x32xf32>
      %66 = arith.addf %62, %65 : vector<8x32xf32>
      %c0_33 = arith.constant 0 : index
      %c0_34 = arith.constant 0 : index
      %67 = vector.load %arg8[%c0_33, %c0_34] : memref<1x32xf32, #tpu.memory_space<vmem>>, vector<1x32xf32>
      %68 = vector.broadcast %67 : vector<1x32xf32> to vector<8x32xf32>
      %69 = arith.addf %66, %68 : vector<8x32xf32>
      %70 = math.tanh %69 : vector<8x32xf32>
      %c0_35 = arith.constant 0 : index
      %c0_36 = arith.constant 0 : index
      %71 = vector.load %arg12[%c0_35, %c0_36] : memref<8x32xf32, #tpu.memory_space<vmem>>, vector<8x32xf32>
      tpu.vector_store %arg12[%c0_35, %c0_36], %40 {strides = array<i32>} : memref<8x32xf32, #tpu.memory_space<vmem>>, vector<8x32xf32>,
      %c0_37 = arith.constant 0 : index
      %c0_38 = arith.constant 0 : index
      %72 = vector.load %arg13[%c0_37, %c0_38] : memref<8x8xf32, #tpu.memory_space<vmem>>, vector<8x8xf32>
      tpu.vector_store %arg13[%c0_37, %c0_38], %55 {strides = array<i32>} : memref<8x8xf32, #tpu.memory_space<vmem>>, vector<8x8xf32>,
      %c0_39 = arith.constant 0 : index
      %c0_40 = arith.constant 0 : index
      %73 = vector.load %arg14[%c0_39, %c0_40] : memref<8x32xf32, #tpu.memory_space<vmem>>, vector<8x32xf32>
      tpu.vector_store %arg14[%c0_39, %c0_40], %59 {strides = array<i32>} : memref<8x32xf32, #tpu.memory_space<vmem>>, vector<8x32xf32>,
      %c0_41 = arith.constant 0 : index
      %c0_42 = arith.constant 0 : index
      %74 = vector.load %arg15[%c0_41, %c0_42] : memref<8x32xf32, #tpu.memory_space<vmem>>, vector<8x32xf32>
      tpu.vector_store %arg15[%c0_41, %c0_42], %70 {strides = array<i32>} : memref<8x32xf32, #tpu.memory_space<vmem>>, vector<8x32xf32>,
    } else {
    }
    %c0 = arith.constant 0 : index
    %c0_1 = arith.constant 0 : index
    %3 = vector.load %arg15[%c0, %c0_1] : memref<8x32xf32, #tpu.memory_space<vmem>>, vector<8x32xf32>
    %4 = arith.truncf %3 : vector<8x32xf32> to vector<8x32xbf16>
    %c0_2 = arith.constant 0 : index
    %c0_3 = arith.constant 0 : index
    %5 = vector.load %arg9[%c0_2, %c0_3] : memref<32x128xbf16, #tpu.memory_space<vmem>>, vector<32x128xbf16>
    %cst = arith.constant dense<0.000000e+00> : vector<8x128xf32>
    %6 = tpu.matmul %4, %5, %cst {dimension_numbers = #tpu.dot_dimension_numbers<[1], [0], [0], [1], [0, 0, 1, 1], [], []>} : vector<8x32xbf16>, vector<32x128xbf16>, vector<8x128xf32> -> vector<8x128xf32>
    %c0_4 = arith.constant 0 : index
    %c0_5 = arith.constant 0 : index
    %7 = vector.load %arg10[%c0_4, %c0_5] : memref<1x128xf32, #tpu.memory_space<vmem>>, vector<1x128xf32>
    %8 = vector.broadcast %7 : vector<1x128xf32> to vector<8x128xf32>
    %9 = arith.addf %6, %8 : vector<8x128xf32>
    %c0_6 = arith.constant 0 : index
    %c0_7 = arith.constant 0 : index
    %10 = vector.load %arg11[%c0_6, %c0_7] : memref<8x128xf32, #tpu.memory_space<vmem>>, vector<8x128xf32>
    tpu.vector_store %arg11[%c0_6, %c0_7], %9 {strides = array<i32>} : memref<8x128xf32, #tpu.memory_space<vmem>>, vector<8x128xf32>,
    return
  }
  func.func @transform_0(%arg0: i32) -> (i32, i32) {
    %c0_i32 = arith.constant 0 : i32
    %c0_i32_0 = arith.constant 0 : i32
    %c0_i32_1 = arith.constant 0 : i32
    return %c0_i32, %c0_i32_0 : i32, i32
  }
  func.func @transform_1(%arg0: i32) -> (i32, i32) {
    %c0_i32 = arith.constant 0 : i32
    %c0_i32_0 = arith.constant 0 : i32
    %c0_i32_1 = arith.constant 0 : i32
    return %c0_i32, %c0_i32_0 : i32, i32
  }
  func.func @transform_2(%arg0: i32) -> (i32, i32, i32) {
    %c0_i32 = arith.constant 0 : i32
    %c0_i32_0 = arith.constant 0 : i32
    %c0_i32_1 = arith.constant 0 : i32
    %c0_i32_2 = arith.constant 0 : i32
    return %c0_i32, %c0_i32_0, %c0_i32_1 : i32, i32, i32
  }
  func.func @transform_3(%arg0: i32) -> (i32, i32) {
    %c0_i32 = arith.constant 0 : i32
    %c0_i32_0 = arith.constant 0 : i32
    %c0_i32_1 = arith.constant 0 : i32
    return %c0_i32, %c0_i32_0 : i32, i32
  }
  func.func @transform_4(%arg0: i32) -> (i32, i32) {
    %c0_i32 = arith.constant 0 : i32
    %c0_i32_0 = arith.constant 0 : i32
    %c0_i32_1 = arith.constant 0 : i32
    return %c0_i32, %c0_i32_0 : i32, i32
  }
  func.func @transform_5(%arg0: i32) -> (i32, i32) {
    %c0_i32 = arith.constant 0 : i32
    %c0_i32_0 = arith.constant 0 : i32
    %c0_i32_1 = arith.constant 0 : i32
    return %c0_i32, %c0_i32_0 : i32, i32
  }
  func.func @transform_6(%arg0: i32) -> (i32, i32) {
    %c0_i32 = arith.constant 0 : i32
    %c0_i32_0 = arith.constant 0 : i32
    %c0_i32_1 = arith.constant 0 : i32
    return %c0_i32, %c0_i32_0 : i32, i32
  }
  func.func @transform_7(%arg0: i32) -> (i32, i32) {
    %c0_i32 = arith.constant 0 : i32
    %c0_i32_0 = arith.constant 0 : i32
    %c0_i32_1 = arith.constant 0 : i32
    return %c0_i32, %c0_i32_0 : i32, i32
  }
  func.func @transform_8(%arg0: i32) -> (i32, i32) {
    %c0_i32 = arith.constant 0 : i32
    %c0_i32_0 = arith.constant 0 : i32
    return %c0_i32, %arg0 : i32, i32
  }
  func.func @transform_9(%arg0: i32) -> (i32, i32) {
    %c0_i32 = arith.constant 0 : i32
    %c0_i32_0 = arith.constant 0 : i32
    return %c0_i32, %arg0 : i32, i32
  }
  func.func @transform_10(%arg0: i32) -> (i32, i32) {
    %c0_i32 = arith.constant 0 : i32
    %c0_i32_0 = arith.constant 0 : i32
    return %c0_i32, %arg0 : i32, i32
  }
  func.func @transform_11(%arg0: i32) -> (i32, i32) {
    %c0_i32 = arith.constant 0 : i32
    %c0_i32_0 = arith.constant 0 : i32
    %c0_i32_1 = arith.constant 0 : i32
    return %c0_i32, %c0_i32_0 : i32, i32
  }
  func.func @transform_12(%arg0: i32) -> (i32, i32) {
    %c0_i32 = arith.constant 0 : i32
    %c0_i32_0 = arith.constant 0 : i32
    %c0_i32_1 = arith.constant 0 : i32
    return %c0_i32, %c0_i32_0 : i32, i32
  }
  func.func @transform_13(%arg0: i32) -> (i32, i32) {
    %c0_i32 = arith.constant 0 : i32
    %c0_i32_0 = arith.constant 0 : i32
    %c0_i32_1 = arith.constant 0 : i32
    return %c0_i32, %c0_i32_0 : i32, i32
  }
}

</mosaic_0001>

<bundles_post_ra>
// kernel: _decoder_step_impl.1
= control target key start
LH: loop header
LB: loop body
LE: loop exit
PB: predicated region body
PF: predicated region fallthrough
CT: control target
= control target key end

     0   :  { %v1134_v0 = vmov 0.0   ;;  %vm1135_vm0 = vmmov 0   ;;  %vm86_vm1 = vcmask 523264   ;;  %s1138_s27 = smov 96   ;;  %v1139_v31 = vmov 1966171168   ;;  %s1511_s3 = inlined_call_operand.vmem [shape: bf16[64,128], index: 3, kind: input, shape index: {}]   ;;  %s1512_s0 = inlined_call_operand.vmem [shape: f32[8,64], index: 0, kind: input, shape index: {}]   ;;  %s1513_s4 = inlined_call_operand.vmem [shape: f32[1,128], index: 4, kind: input, shape index: {}]   ;;  %s1514_s2 = inlined_call_operand.vmem [shape: f32[8,8,32], index: 2, kind: input, shape index: {}]   ;;  %s1515_s1 = inlined_call_operand.vmem [shape: f32[8,32], index: 1, kind: input, shape index: {}]   ;;  %s1516_s11 = inlined_call_operand.vmem [shape: f32[8,32], index: 11, kind: output, shape index: {1}]   ;;  %s1517_s6 = inlined_call_operand.vmem [shape: bf16[32,32], index: 6, kind: input, shape index: {}]   ;;  %s1518_s5 = inlined_call_operand.vmem [shape: bf16[32,32], index: 5, kind: input, shape index: {}]   ;;  %s1519_s12 = inlined_call_operand.vmem [shape: f32[8,8], index: 12, kind: output, shape index: {2}]   ;;  %s1520_s13 = inlined_call_operand.vmem [shape: f32[8,32], index: 13, kind: output, shape index: {3}]   ;;  %s1521_s8 = inlined_call_operand.vmem [shape: bf16[32,128], index: 8, kind: input, shape index: {}]   ;;  %s1522_s7 = inlined_call_operand.vmem [shape: f32[1,32], index: 7, kind: input, shape index: {}]   ;;  %s1523_s9 = inlined_call_operand.vmem [shape: f32[1,128], index: 9, kind: input, shape index: {}]   ;;  %s1524_s10 = inlined_call_operand.vmem [shape: f32[8,128], index: 10, kind: output, shape index: {0}]  }
   0x1   :  { %1053 = vmatprep.subr.bf16.mxu0 %v1134_v0  ;;  %v1098_v1 = vld [vmem:[%s1511_s3] sm:$0xff]   ;;  %1061 = vmatprep.mubr.msk.bf16.mxu0 %vm1135_vm0, %v1134_v0  ;;  %v1099_v2 = vld [vmem:[%s1511_s3 + $0x8] sm:$0xff]   ;;  %v1100_v3 = vld [vmem:[%s1511_s3 + $0x10] sm:$0xff]   ;;  %v170_v32 = vunpack.c.l.s4 %v1139_v31  ;;  %v172_v33 = vlaneseq  ;;  %vm329_vm2 = vcmask 261120   ;;  %vm396_vm3 = vcmask 1041409  }
   0x2   :  { %1065 = vmatprep.subr.bf16.mxu1 %v1134_v0  ;;  %1069 = vmatprep.mubr.msk.bf16.mxu1 %vm1135_vm0, %v1134_v0  ;;  %v1101_v4 = vld [vmem:[%s1511_s3 + $0x18] sm:$0xff]   ;;  %v45_v5 = vld [vmem:[%s1512_s0] sm:$0xff]  ;;  %s1136_s0 = smov 32   ;;  %s1137_s3 = smov 64   ;;  %v1252_v20 = vld [vmem:[%s1514_s2 + $0x10] sm:$0xff]  ;;  %vm398_vm4 = vcmask 1042434  }
   0x3   :  { %1054 = vmatpush3.bf16.msra.mxu0 %v1098_v1  ;;  %v46_v6 = vpack.c.bf16 %v45_v5, %v45_v5  ;;  %v1021_v7 = vld [vmem:[%s1513_s4] ss:$0 sm:$0xff]  ;;  %v1266_v22 = vld [vmem:[%s1514_s2 + $0x30] sm:$0xff]  ;;  %v1278_v27 = vld [vmem:[%s1514_s2 + $0x8] sm:$0xff]  ;;  %v171_v35 = vunpack.c.0.s8 %v170_v32  ;;  %v1304_v36 = vshrl.u32 %v172_v33, 7  ;;  %vm400_vm5 = vcmask 1043459  }
   0x4   :  { %1055 = vmatprep.subr.bf16.mxu0 %v1134_v0  ;;  %v1245_v19 = vld [vmem:[%s1514_s2] sm:$0xff]  ;;  %v1285_v28 = vld [vmem:[%s1514_s2 + $0x18] sm:$0xff]  ;;  %v1292_v29 = vld [vmem:[%s1514_s2 + $0x28] sm:$0xff]  ;;  %vm402_vm6 = vcmask 1044484   ;;  %vm404_vm7 = vcmask 1045509   ;;  %vm406_vm8 = vcmask 1046534  }
   0x5   :  { %v1259_v21 = vld [vmem:[%s1514_s2 + $0x20] sm:$0xff]  ;;  %v1299_v30 = vld [vmem:[%s1514_s2 + $0x38] sm:$0xff]  ;;  %v174_v41 = vsub.s32 %v171_v35, %v1304_v36  ;;  %v1311_v46 = vsub.s32 0, %v1304_v36  ;;  %vm408_vm9 = vcmask 1047559   ;;  %vm411_vm10 = vcmask 64512  }
   0x6   :  { %v44_v26 = vld [vmem:[%s1515_s1] sm:$0xff] }
   0x7   :  { %1056 = vmatpush3.bf16.msra.mxu0 %v1099_v2 }
   0x8   :  { %1057 = vmatprep.subr.bf16.mxu0 %v1134_v0 }
   0xb   :  { %1058 = vmatpush3.bf16.msra.mxu0 %v1100_v3 }
   0xc   :  { %1059 = vmatprep.subr.bf16.mxu0 %v1134_v0 }
   0xf   :  { %1060 = vmatpush3.bf16.msra.mxu0 %v1101_v4 }
  0x10   :  { %1081 = vmatprep.subr.bf16.mxu0 %v1134_v0 }
  0x12   :  { %1062 = vmatmul.mubr.msk.bf16.vlgmr.msra.gmra.mrb[0].mxu0 %vm86_vm1, %v46_v6 }
  0x13   :  { %1085 = vmatprep.mubr.msk.bf16.mxu0 %vm1135_vm0, %v1134_v0 }
  0xe5   :  { %v124_v8 = vpop.f32.mrb[0].mxu0 }
  0xe6   :  { %v125_v9 = vadd.f32 %v1021_v7, %v124_v8  ;;  %v1063_v10 = vpop.f32.mrb[1].mxu0 }
  0xe7   :  { %v127_v11 = vpop.f32.mrb[2].mxu0 }
  0xe8   :  { %137 = vrot.lane.b32.xlu0 %v125_v9, %s1136_s0  ;;  %v1064_v12 = vpop.f32.mrb[3].mxu0  ;;  %v1027_v13 = vmul.f32 -1.442695, %v125_v9 }
  0xea   :  { %1108 = vpow2.f32 %v1027_v13 }
  0xf4   :  { %v1109_v14 = vpop.eup %1108 }
  0xf5   :  { %v133_v15 = vadd.f32 1.0, %v1109_v14 }
  0xf7   :  { %1110 = vrcp.f32 %v133_v15 }
 0x101   :  { %v1111_v16 = vpop.eup %1110 }
 0x102   :  { %v147_v37 = vsub.f32 1.0, %v1111_v16 }
 0x15a   :  { %v138_v17 = vpop.permute.xlu0 %137 }
 0x15b   :  { %v140_v18 = vmul.f32 %v1111_v16, %v138_v17 }
 0x15d   :  { %142 = vrot.lane.b32.xlu0 %v140_v18, %s1137_s3 }
 0x161   :  { %265 = vrot.lane.b32.xlu0 %v1245_v19, %s1136_s0 }
 0x165   :  { %269 = vrot.lane.b32.xlu0 %v1252_v20, %s1136_s0 }
 0x169   :  { %273 = vrot.lane.b32.xlu0 %v1259_v21, %s1136_s0 }
 0x16d   :  { %277 = vrot.lane.b32.xlu0 %v1266_v22, %s1136_s0 }
 0x1cf   :  { %v143_v23 = vpop.permute.xlu0 %142 }
 0x1d0   :  { %v145_v24 = vadd.f32 %v143_v23, %v125_v9 }
 0x1d2   :  { %1112 = vtanh.f32 %v145_v24 }
 0x1d3   :  { %v266_v42 = vpop.permute.xlu0 %265 }
 0x1d7   :  { %v270_v51 = vpop.permute.xlu0 %269 }
 0x1db   :  { %v274_v2 = vpop.permute.xlu0 %273 }
 0x1dc   :  { %v1113_v25 = vpop.eup %1112 }
 0x1dd   :  { %149 = vrot.lane.b32.xlu1 %v1113_v25, %s1138_s27 }
 0x1df   :  { %v278_v12 = vpop.permute.xlu0 %277 }
 0x1e1   :  { %154 = vrot.lane.b32.xlu1 %v44_v26, %s1136_s0 }
 0x1e5   :  { %267 = vrot.lane.b32.xlu1 %v1278_v27, %s1136_s0 }
 0x1e9   :  { %271 = vrot.lane.b32.xlu1 %v1285_v28, %s1136_s0 }
 0x1ed   :  { %275 = vrot.lane.b32.xlu1 %v1292_v29, %s1136_s0 }
 0x1f1   :  { %279 = vrot.lane.b32.xlu1 %v1299_v30, %s1136_s0 }
 0x24f   :  { %v150_v34 = vpop.permute.xlu1 %149 }
 0x250   :  { %v152_v39 = vmul.f32 %v150_v34, %v147_v37 }
 0x253   :  { %v155_v38 = vpop.permute.xlu1 %154 }
 0x254   :  { %v157_v40 = vmul.f32 %v1111_v16, %v155_v38 }
 0x256   :  { %v1307_v43 = vadd.f32 %v157_v40, %v152_v39 }
 0x257   :  { %v268_v44 = vpop.permute.xlu1 %267 }
 0x258   :  { %v175_v45 = vrot.slane %v1307_v43, %v174_v41  ;;  %v168_v47 = vcombine.high %v1307_v43, %v1307_v43 }
 0x25a   :  { %v191_v48 = vrot.slane %v175_v45, %v174_v41  ;;  %v183_v49 = vcombine.high %v175_v45, %v175_v45  ;;  %v182_v50 = vrot.slane %v168_v47, %v174_v41  ;;  %v363_v45 = vand.u32 127, %v172_v33 }
 0x25b   :  { %v272_v55 = vpop.permute.xlu1 %271 }
 0x25c   :  { %v220_v52 = vrot.slane %v191_v48, %v1311_v46  ;;  %v205_v53 = vrot.slane %v183_v49, %v174_v41  ;;  %v213_v54 = vcombine.high %v191_v48, %v191_v48  ;;  %v198_v56 = vrot.slane %v182_v50, %v174_v41 }
 0x25d   :  { %v184_v57 = vcombine.high %v182_v50, %v182_v50  ;;  %v1341_v48 = vsub.s32 %v363_v45, %v1304_v36 }
 0x25e   :  { %v289_v58 = vmul.f32 %v266_v42, %v220_v52  ;;  %v224_v59 = vrot.slane %v205_v53, %v1311_v46  ;;  %v228_v60 = vrot.slane %v213_v54, %v1311_v46  ;;  %v215_v61 = vcombine.high %v205_v53, %v205_v53 }
 0x25f   :  { %v212_v1 = vrot.slane %v184_v57, %v174_v41  ;;  %v236_v4 = vrot.slane %v198_v56, %v1311_v46  ;;  %v214_v5 = vcombine.high %v198_v56, %v198_v56  ;;  %v276_v6 = vpop.permute.xlu1 %275 }
 0x260   :  { %v290_v62 = vmul.f32 %v268_v44, %v224_v59  ;;  %v232_v63 = vrot.slane %v215_v61, %v1311_v46  ;;  %305 = vrot.lane.b32.xlu0 %v289_v58, %s1138_s27  ;;  %v291_v3 = vmul.f32 %v270_v51, %v228_v60 }
 0x261   :  { %v240_v8 = vrot.slane %v212_v1, %v1311_v46  ;;  %v216_v9 = vcombine.high %v212_v1, %v212_v1  ;;  %v293_v10 = vmul.f32 %v274_v2, %v236_v4  ;;  %v244_v11 = vrot.slane %v214_v5, %v1311_v46 }
 0x262   :  { %307 = vrot.lane.b32.xlu1 %v290_v62, %s1138_s27  ;;  %v292_v7 = vmul.f32 %v272_v55, %v232_v63 }
 0x263   :  { %v294_v13 = vmul.f32 %v276_v6, %v240_v8  ;;  %v248_v14 = vrot.slane %v216_v9, %v1311_v46  ;;  %v280_v15 = vpop.permute.xlu1 %279  ;;  %v295_v16 = vmul.f32 %v278_v12, %v244_v11  ;;  %v1140_v8 = vmov 0  }
 0x264   :  { %309 = vrot.lane.b32.xlu0 %v291_v3, %s1138_s27  ;;  %1097 = vset.pattern.permute.xlu1 %v1140_v8  ;;  %v422_v9 = vsub.s32 1, %v1304_v36  ;;  %v430_v11 = vsub.s32 3, %v1304_v36 }
 0x265   :  { %v296_v17 = vmul.f32 %v280_v15, %v248_v14  ;;  %1096 = vset.pattern.permute.xlu0 %v1140_v8 }
 0x266   :  { %311 = vrot.lane.b32.xlu1 %v292_v7, %s1138_s27 }
 0x268   :  { %313 = vrot.lane.b32.xlu0 %v293_v10, %s1138_s27  ;;  %v426_v10 = vsub.s32 2, %v1304_v36 }
 0x26a   :  { %315 = vrot.lane.b32.xlu1 %v294_v13, %s1138_s27 }
 0x26c   :  { %317 = vrot.lane.b32.xlu0 %v295_v16, %s1138_s27 }
 0x26e   :  { %319 = vrot.lane.b32.xlu1 %v296_v17, %s1138_s27 }
 0x2d2   :  { %v306_v18 = vpop.permute.xlu0 %305 }
 0x2d3   :  { %v330_v23 = vsel %vm329_vm2, %v306_v18, 0.0  ;;  %v434_v18 = vsub.s32 4, %v1304_v36 }
 0x2d4   :  { %v308_v24 = vpop.permute.xlu1 %307  ;;  %331 = vadd.xlane.f32.xlu0 %v330_v23 }
 0x2d5   :  { %v333_v25 = vsel %vm329_vm2, %v308_v24, 0.0 }
 0x2d6   :  { %334 = vadd.xlane.f32.xlu1 %v333_v25  ;;  %v310_v26 = vpop.permute.xlu0 %309 }
 0x2d7   :  { %v336_v31 = vsel %vm329_vm2, %v310_v26, 0.0 }
 0x2d8   :  { %v312_v32 = vpop.permute.xlu1 %311  ;;  %337 = vadd.xlane.f32.xlu0 %v336_v31  ;;  %v438_v31 = vsub.s32 5, %v1304_v36 }
 0x2d9   :  { %v339_v35 = vsel %vm329_vm2, %v312_v32, 0.0 }
 0x2da   :  { %v314_v34 = vpop.permute.xlu0 %313 }
 0x2db   :  { %v342_v37 = vsel %vm329_vm2, %v314_v34, 0.0 }
 0x2dc   :  { %v316_v38 = vpop.permute.xlu1 %315  ;;  %340 = vadd.xlane.f32.xlu0 %v339_v35  ;;  %343 = vadd.xlane.f32.xlu1 %v342_v37  ;;  %v442_v37 = vsub.s32 6, %v1304_v36 }
 0x2dd   :  { %v345_v40 = vsel %vm329_vm2, %v316_v38, 0.0 }
 0x2de   :  { %v318_v39 = vpop.permute.xlu0 %317 }
 0x2df   :  { %v348_v41 = vsel %vm329_vm2, %v318_v39, 0.0 }
 0x2e0   :  { %v320_v42 = vpop.permute.xlu1 %319  ;;  %346 = vadd.xlane.f32.xlu0 %v345_v40  ;;  %349 = vadd.xlane.f32.xlu1 %v348_v41  ;;  %v446_v41 = vsub.s32 7, %v1304_v36 }
 0x2e1   :  { %v351_v44 = vsel %vm329_vm2, %v320_v42, 0.0 }
 0x2e4   :  { %352 = vadd.xlane.f32.xlu0 %v351_v44 }
 0x361   :  { %v332_v47 = vpop.xlane.xlu0 %331 }
 0x362   :  { %v367_v52 = vrot.slane %v332_v47, %v1341_v48 }
 0x363   :  { %v335_v49 = vpop.xlane.xlu1 %334 }
 0x364   :  { %v371_v50 = vrot.slane %v335_v49, %v1341_v48 }
 0x365   :  { %v338_v51 = vpop.xlane.xlu0 %337 }
 0x366   :  { %v375_v53 = vrot.slane %v338_v51, %v1341_v48  ;;  %v397_v54 = vsel %vm396_vm3, %v371_v50, %v367_v52 }
 0x368   :  { %v399_v57 = vsel %vm398_vm4, %v375_v53, %v397_v54 }
 0x369   :  { %v344_v55 = vpop.xlane.xlu1 %343  ;;  %v341_v56 = vpop.xlane.xlu0 %340 }
 0x36a   :  { %v379_v33 = vrot.slane %v341_v56, %v1341_v48  ;;  %v383_v58 = vrot.slane %v344_v55, %v1341_v48 }
 0x36c   :  { %v401_v59 = vsel %vm400_vm5, %v379_v33, %v399_v57 }
 0x36d   :  { %v350_v60 = vpop.xlane.xlu1 %349  ;;  %v347_v61 = vpop.xlane.xlu0 %346  ;;  %v403_v1 = vsel %vm402_vm6, %v383_v58, %v401_v59 }
 0x36e   :  { %v387_v62 = vrot.slane %v347_v61, %v1341_v48  ;;  %v391_v63 = vrot.slane %v350_v60, %v1341_v48 }
 0x370   :  { %v405_v2 = vsel %vm404_vm7, %v387_v62, %v403_v1 }
 0x371   :  { %v353_v3 = vpop.xlane.xlu0 %352  ;;  %v407_v5 = vsel %vm406_vm8, %v391_v63, %v405_v2 }
 0x372   :  { %v395_v4 = vrot.slane %v353_v3, %v1341_v48 }
 0x374   :  { %v409_v6 = vsel %vm408_vm9, %v395_v4, %v407_v5 }
 0x375   :  { %v412_v7 = vsel %vm411_vm10, %v409_v6, -inf }
 0x376   :  { %413 = vmax.xlane.f32.xlu1 %v412_v7 }
 0x403   :  { %v414_v12 = vpop.xlane.xlu1 %413 }
 0x404   :  { %v419_v13 = vrot.slane %v414_v12, %v1311_v46  ;;  %v423_v14 = vrot.slane %v414_v12, %v422_v9  ;;  %v427_v15 = vrot.slane %v414_v12, %v426_v10  ;;  %v431_v23 = vrot.slane %v414_v12, %v430_v11 }
 0x405   :  { %v435_v32 = vrot.slane %v414_v12, %v434_v18  ;;  %v439_v38 = vrot.slane %v414_v12, %v438_v31  ;;  %v443_v42 = vrot.slane %v414_v12, %v442_v37  ;;  %v447_v50 = vrot.slane %v414_v12, %v446_v41 }
 0x406   :  { %v456_v16 = vsub.f32 %v332_v47, %v419_v13  ;;  %v457_v17 = vsub.f32 %v335_v49, %v423_v14  ;;  %v458_v24 = vsub.f32 %v338_v51, %v427_v15  ;;  %v459_v34 = vsub.f32 %v341_v56, %v431_v23 }
 0x407   :  { %v460_v39 = vsub.f32 %v344_v55, %v435_v32  ;;  %v461_v44 = vsub.f32 %v347_v61, %v439_v38  ;;  %v462_v51 = vsub.f32 %v350_v60, %v443_v42  ;;  %v463_v54 = vsub.f32 %v353_v3, %v447_v50 }
 0x408   :  { %v464_v25 = vmul.f32 1.442695, %v456_v16  ;;  %v466_v26 = vmul.f32 1.442695, %v457_v17  ;;  %v468_v35 = vmul.f32 1.442695, %v458_v24 }
 0x409   :  { %v470_v40 = vmul.f32 1.442695, %v459_v34  ;;  %v472_v45 = vmul.f32 1.442695, %v460_v39  ;;  %v474_v52 = vmul.f32 1.442695, %v461_v44 }
 0x40a   :  { %1114 = vpow2.f32 %v464_v25  ;;  %v476_v55 = vmul.f32 1.442695, %v462_v51  ;;  %v478_v33 = vmul.f32 1.442695, %v463_v54 }
 0x40b   :  { %1116 = vpow2.f32 %v466_v26 }
 0x40c   :  { %1118 = vpow2.f32 %v468_v35 }
 0x40d   :  { %1120 = vpow2.f32 %v470_v40 }
 0x40e   :  { %1122 = vpow2.f32 %v472_v45 }
 0x40f   :  { %1124 = vpow2.f32 %v474_v52 }
 0x410   :  { %1126 = vpow2.f32 %v476_v55 }
 0x411   :  { %1128 = vpow2.f32 %v478_v33 }
 0x414   :  { %v1115_v47 = vpop.eup %1114 }
 0x415   :  { %v1117_v49 = vpop.eup %1116  ;;  %489 = vperm.xlu0 %1096, %v1115_v47  }
 0x416   :  { %492 = vperm.xlu1 %1097, %v1117_v49   ;;  %v1119_v53 = vpop.eup %1118 }
 0x417   :  { %v1121_v56 = vpop.eup %1120 }
 0x418   :  { %v1123_v57 = vpop.eup %1122 }
 0x419   :  { %v1125_v58 = vpop.eup %1124 }
 0x41a   :  { %495 = vperm.xlu1 %1097, %v1119_v53   ;;  %v1127_v59 = vpop.eup %1126 }
 0x41b   :  { %v1129_v61 = vpop.eup %1128 }
 0x41e   :  { %498 = vperm.xlu1 %1097, %v1121_v56  }
 0x422   :  { %501 = vperm.xlu1 %1097, %v1123_v57  }
 0x426   :  { %504 = vperm.xlu1 %1097, %v1125_v58  }
 0x42a   :  { %507 = vperm.xlu1 %1097, %v1127_v59  }
 0x42e   :  { %510 = vperm.xlu1 %1097, %v1129_v61  }
 0x494   :  { %v490_v2 = vpop.permute.xlu0 %489 }
 0x495   :  { %v493_v60 = vpop.permute.xlu1 %492  ;;  %v515_v5 = vrot.slane %v490_v2, %v1341_v48 }
 0x496   :  { %v519_v4 = vrot.slane %v493_v60, %v1341_v48 }
 0x498   :  { %v544_v13 = vsel %vm396_vm3, %v519_v4, %v515_v5 }
 0x499   :  { %v496_v62 = vpop.permute.xlu1 %495 }
 0x49a   :  { %v523_v6 = vrot.slane %v496_v62, %v1341_v48 }
 0x49c   :  { %v545_v15 = vsel %vm398_vm4, %v523_v6, %v544_v13 }
 0x49d   :  { %v499_v63 = vpop.permute.xlu1 %498 }
 0x49e   :  { %v527_v7 = vrot.slane %v499_v63, %v1341_v48 }
 0x4a0   :  { %v546_v17 = vsel %vm400_vm5, %v527_v7, %v545_v15 }
 0x4a1   :  { %v502_v1 = vpop.permute.xlu1 %501 }
 0x4a2   :  { %v531_v8 = vrot.slane %v502_v1, %v1341_v48 }
 0x4a4   :  { %v547_v23 = vsel %vm402_vm6, %v531_v8, %v546_v17 }
 0x4a5   :  { %v505_v3 = vpop.permute.xlu1 %504 }
 0x4a6   :  { %v535_v14 = vrot.slane %v505_v3, %v1341_v48 }
 0x4a8   :  { %v548_v25 = vsel %vm404_vm7, %v535_v14, %v547_v23 }
 0x4a9   :  { %v508_v12 = vpop.permute.xlu1 %507 }
 0x4aa   :  { %v539_v16 = vrot.slane %v508_v12, %v1341_v48 }
 0x4ac   :  { %v549_v32 = vsel %vm406_vm8, %v539_v16, %v548_v25 }
 0x4ad   :  { %v511_v24 = vpop.permute.xlu1 %510 }
 0x4ae   :  { %v543_v26 = vrot.slane %v511_v24, %v1341_v48 }
 0x4b0   :  { %v550_v34 = vsel %vm408_vm9, %v543_v26, %v549_v32 }
 0x4b1   :  { %v552_v35 = vsel %vm411_vm10, %v550_v34, 0.0 }
 0x4b2   :  { %553 = vadd.xlane.f32.xlu1 %v552_v35 }
 0x4c3   :  { %872 = vrot.lane.b32.xlu1 %v1307_v43, %s1138_s27 }
 0x53f   :  { %v554_v38 = vpop.xlane.xlu1 %553 }
 0x540   :  { %1130 = vrcp.f32 %v554_v38 }
 0x543   :  { %v873_v39 = vpop.permute.xlu1 %872 }
 0x544   :  { %875 = vst.msk [vmem:[%s1516_s11] sm:$0xff] %vm329_vm2, %v873_v39 }
 0x54a   :  { %v1131_v40 = vpop.eup %1130 }
 0x54b   :  { %v560_v42 = vrot.slane %v1131_v40, %v1311_v46  ;;  %v564_v45 = vrot.slane %v1131_v40, %v422_v9  ;;  %v568_v51 = vrot.slane %v1131_v40, %v426_v10  ;;  %v572_v54 = vrot.slane %v1131_v40, %v430_v11 }
 0x54c   :  { %v576_v33 = vrot.slane %v1131_v40, %v434_v18  ;;  %v580_v9 = vrot.slane %v1131_v40, %v438_v31  ;;  %v584_v10 = vrot.slane %v1131_v40, %v442_v37  ;;  %v588_v11 = vrot.slane %v1131_v40, %v446_v41  ;;  %v1102_v31 = vld [vmem:[%s1517_s6] sm:$0xff]   ;;  %v1103_v37 = vld [vmem:[%s1517_s6 + $0x8] sm:$0xff]  }
 0x54d   :  { %v597_v44 = vmul.f32 %v1115_v47, %v560_v42  ;;  %v598_v50 = vmul.f32 %v1117_v49, %v564_v45  ;;  %v599_v52 = vmul.f32 %v1119_v53, %v568_v51  ;;  %v600_v55 = vmul.f32 %v1121_v56, %v572_v54  ;;  %1066 = vmatpush3.bf16.msra.mxu1 %v1102_v31 }
 0x54e   :  { %v601_v46 = vmul.f32 %v1123_v57, %v576_v33  ;;  %v602_v47 = vmul.f32 %v1125_v58, %v580_v9  ;;  %v603_v49 = vmul.f32 %v1127_v59, %v584_v10  ;;  %v604_v53 = vmul.f32 %v1129_v61, %v588_v11  ;;  %1067 = vmatprep.subr.bf16.mxu1 %v1134_v0 }
 0x54f   :  { %607 = vperm.xlu0 %1096, %v597_v44   ;;  %v709_v18 = vpack.c.bf16 %v1307_v43, %v1307_v43 }
 0x551   :  { %1068 = vmatpush3.bf16.msra.mxu1 %v1103_v37 }
 0x552   :  { %1073 = vmatprep.subr.bf16.mxu1 %v1134_v0 }
 0x553   :  { %612 = vperm.xlu0 %1096, %v598_v50  }
 0x557   :  { %617 = vperm.xlu0 %1096, %v599_v52  }
 0x55b   :  { %622 = vperm.xlu0 %1096, %v600_v55  }
 0x55f   :  { %627 = vperm.xlu0 %1096, %v601_v46  }
 0x563   :  { %632 = vperm.xlu0 %1096, %v602_v47  }
 0x567   :  { %637 = vperm.xlu0 %1096, %v603_v49  }
 0x56b   :  { %642 = vperm.xlu0 %1096, %v604_v53  }
 0x56f   :  { %806 = vrot.lane.b32.xlu0 %v709_v18, %s1138_s27 }
 0x5ce   :  { %v608_v36 = vpop.permute.xlu0 %607 }
 0x5cf   :  { %v645_v41 = vmul.f32 %v608_v36, %v1245_v19  ;;  %v879_v24 = vrot.slane %v608_v36, %v1341_v48 }
 0x5d1   :  { %v653_v57 = vsel %vm329_vm2, %v645_v41, 0.0 }
 0x5d2   :  { %v613_v43 = vpop.permute.xlu0 %612  ;;  %v654_v60 = vrot.slane %v653_v57, 4 }
 0x5d3   :  { %v646_v56 = vmul.f32 %v613_v43, %v1278_v27  ;;  %v883_v14 = vrot.slane %v613_v43, %v1341_v48 }
 0x5d4   :  { %v655_v4 = vadd.f32 %v654_v60, %v653_v57 }
 0x5d5   :  { %v660_v58 = vsel %vm329_vm2, %v646_v56, 0.0  ;;  %v908_v38 = vsel %vm396_vm3, %v883_v14, %v879_v24 }
 0x5d6   :  { %v618_v59 = vpop.permute.xlu0 %617  ;;  %v661_v62 = vrot.slane %v660_v58, 4  ;;  %v656_v12 = vrot.slane %v655_v4, 2 }
 0x5d7   :  { %v647_v61 = vmul.f32 %v618_v59, %v1252_v20  ;;  %v887_v17 = vrot.slane %v618_v59, %v1341_v48 }
 0x5d8   :  { %v662_v19 = vadd.f32 %v661_v62, %v660_v58 }
 0x5d9   :  { %v667_v63 = vsel %vm329_vm2, %v647_v61, 0.0  ;;  %v909_v44 = vsel %vm398_vm4, %v887_v17, %v908_v38 }
 0x5da   :  { %v668_v1 = vrot.slane %v667_v63, 4  ;;  %v623_v2 = vpop.permute.xlu0 %622  ;;  %v663_v13 = vrot.slane %v662_v19, 2 }
 0x5db   :  { %v648_v3 = vmul.f32 %v623_v2, %v1285_v28  ;;  %v891_v25 = vrot.slane %v623_v2, %v1341_v48 }
 0x5dc   :  { %v669_v5 = vadd.f32 %v668_v1, %v667_v63  ;;  %v664_v34 = vadd.f32 %v663_v13, %v662_v19 }
 0x5dd   :  { %v674_v27 = vsel %vm329_vm2, %v648_v3, 0.0  ;;  %v910_v52 = vsel %vm400_vm5, %v891_v25, %v909_v44 }
 0x5de   :  { %v675_v6 = vrot.slane %v674_v27, 4  ;;  %v628_v7 = vpop.permute.xlu0 %627  ;;  %v670_v15 = vrot.slane %v669_v5, 2  ;;  %v665_v46 = vrot.slane %v664_v34, 1 }
 0x5df   :  { %v649_v8 = vmul.f32 %v628_v7, %v1259_v21  ;;  %v657_v21 = vadd.f32 %v656_v12, %v655_v4  ;;  %v895_v35 = vrot.slane %v628_v7, %v1341_v48 }
 0x5e0   :  { %v676_v20 = vadd.f32 %v675_v6, %v674_v27  ;;  %v671_v39 = vadd.f32 %v670_v15, %v669_v5  ;;  %v666_v58 = vadd.f32 %v665_v46, %v664_v34 }
 0x5e1   :  { %v681_v16 = vsel %vm329_vm2, %v649_v8, 0.0  ;;  %v658_v33 = vrot.slane %v657_v21, 1  ;;  %v911_v9 = vsel %vm402_vm6, %v895_v35, %v910_v52 }
 0x5e2   :  { %v677_v28 = vrot.slane %v676_v20, 2  ;;  %v633_v23 = vpop.permute.xlu0 %632  ;;  %v682_v26 = vrot.slane %v681_v16, 4  ;;  %v672_v10 = vrot.slane %v671_v39, 1  ;;  %v715_v19 = vpack.c.bf16 %v666_v58, %v666_v58 }
 0x5e3   :  { %v650_v32 = vmul.f32 %v633_v23, %v1292_v29  ;;  %v899_v50 = vrot.slane %v633_v23, %v1341_v48  ;;  %v659_v57 = vadd.f32 %v658_v33, %v657_v21 }
 0x5e4   :  { %v683_v40 = vadd.f32 %v682_v26, %v681_v16  ;;  %v678_v45 = vadd.f32 %v677_v28, %v676_v20  ;;  %v673_v60 = vadd.f32 %v672_v10, %v671_v39  ;;  %v735_v16 = vunpack.c.l.b16 %v715_v19 }
 0x5e5   :  { %v688_v42 = vsel %vm329_vm2, %v650_v32, 0.0  ;;  %v912_v31 = vsel %vm404_vm7, %v899_v50, %v911_v9  ;;  %v714_v6 = vpack.c.bf16 %v659_v57, %v659_v57  ;;  %v925_v14 = vsel %vm396_vm3, %v666_v58, %v659_v57  ;;  %v1034_v57 = vld [vmem:[%s1522_s7] ss:$0 sm:$0xff] }
 0x5e6   :  { %v638_v51 = vpop.permute.xlu0 %637  ;;  %v684_v54 = vrot.slane %v683_v40, 2  ;;  %v689_v29 = vrot.slane %v688_v42, 4  ;;  %v679_v18 = vrot.slane %v678_v45, 1  ;;  %v716_v7 = vpack.c.bf16 %v673_v60, %v673_v60 }
 0x5e7   :  { %v651_v55 = vmul.f32 %v638_v51, %v1266_v22  ;;  %v903_v47 = vrot.slane %v638_v51, %v1341_v48  ;;  %v734_v24 = vunpack.c.l.b16 %v714_v6  ;;  %v926_v26 = vsel %vm398_vm4, %v673_v60, %v925_v14 }
 0x5e8   :  { %v685_v49 = vadd.f32 %v684_v54, %v683_v40  ;;  %v690_v11 = vadd.f32 %v689_v29, %v688_v42  ;;  %v680_v2 = vadd.f32 %v679_v18, %v678_v45  ;;  %v736_v25 = vunpack.c.l.b16 %v716_v7 }
 0x5e9   :  { %v695_v53 = vsel %vm329_vm2, %v651_v55, 0.0  ;;  %v913_v61 = vsel %vm406_vm8, %v903_v47, %v912_v31  ;;  %v742_v40 = vsel %vm396_vm3, %v735_v16, %v734_v24  ;;  %v1106_v31 = vld [vmem:[%s1521_s8] sm:$0xff]  }
 0x5ea   :  { %v696_v37 = vrot.slane %v695_v53, 4  ;;  %v643_v36 = vpop.permute.xlu0 %642  ;;  %v686_v41 = vrot.slane %v685_v49, 1  ;;  %v691_v43 = vrot.slane %v690_v11, 2  ;;  %v717_v12 = vpack.c.bf16 %v680_v2, %v680_v2  ;;  %1082 = vmatpush3.bf16.msra.mxu0 %v1106_v31 }
 0x5eb   :  { %v652_v22 = vmul.f32 %v643_v36, %v1299_v30  ;;  %v907_v56 = vrot.slane %v643_v36, %v1341_v48  ;;  %v927_v21 = vsel %vm400_vm5, %v680_v2, %v926_v26  ;;  %v743_v50 = vsel %vm398_vm4, %v736_v25, %v742_v40  ;;  %1083 = vmatprep.subr.bf16.mxu0 %v1134_v0  ;;  %v1035_v2 = vld [vmem:[%s1523_s9] ss:$0 sm:$0xff] }
 0x5ec   :  { %v697_v59 = vadd.f32 %v696_v37, %v695_v53  ;;  %v692_v62 = vadd.f32 %v691_v43, %v690_v11  ;;  %v687_v30 = vadd.f32 %v686_v41, %v685_v49  ;;  %v737_v32 = vunpack.c.l.b16 %v717_v12  ;;  %v1104_v49 = vld [vmem:[%s1518_s5] sm:$0xff]   ;;  %v1105_v53 = vld [vmem:[%s1518_s5 + $0x8] sm:$0xff]  }
 0x5ed   :  { %v702_v63 = vsel %vm329_vm2, %v652_v22, 0.0  ;;  %v914_v1 = vsel %vm408_vm9, %v907_v56, %v913_v61  ;;  %v1107_v37 = vld [vmem:[%s1521_s8 + $0x8] sm:$0xff]  }
 0x5ee   :  { %v698_v3 = vrot.slane %v697_v59, 2  ;;  %v703_v4 = vrot.slane %v702_v63, 4  ;;  %916 = vst.msk [vmem:[%s1519_s12] sm:$0xff] %vm411_vm10, %v914_v1  ;;  %v693_v48 = vrot.slane %v692_v62, 1  ;;  %v718_v15 = vpack.c.bf16 %v687_v30, %v687_v30  ;;  %v807_v18 = vpop.permute.xlu0 %806  ;;  %1084 = vmatpush3.bf16.msra.mxu0 %v1107_v37 }
 0x5ef   :  { %v928_v39 = vsel %vm402_vm6, %v687_v30, %v927_v21  ;;  %v744_v54 = vsel %vm400_vm5, %v737_v32, %v743_v50 }
 0x5f0   :  { %v699_v5 = vadd.f32 %v698_v3, %v697_v59  ;;  %v704_v27 = vadd.f32 %v703_v4, %v702_v63  ;;  %v694_v8 = vadd.f32 %v693_v48, %v692_v62  ;;  %v738_v38 = vunpack.c.l.b16 %v718_v15 }
 0x5f2   :  { %v700_v13 = vrot.slane %v699_v5, 1  ;;  %v705_v20 = vrot.slane %v704_v27, 2  ;;  %v719_v17 = vpack.c.bf16 %v694_v8, %v694_v8  ;;  %v929_v44 = vsel %vm404_vm7, %v694_v8, %v928_v39 }
 0x5f3   :  { %v745_v33 = vsel %vm402_vm6, %v738_v38, %v744_v54 }
 0x5f4   :  { %v701_v28 = vadd.f32 %v700_v13, %v699_v5  ;;  %v706_v23 = vadd.f32 %v705_v20, %v704_v27  ;;  %v739_v42 = vunpack.c.l.b16 %v719_v17 }
 0x5f6   :  { %v720_v34 = vpack.c.bf16 %v701_v28, %v701_v28  ;;  %v707_v35 = vrot.slane %v706_v23, 1  ;;  %v930_v52 = vsel %vm406_vm8, %v701_v28, %v929_v44  ;;  %v746_v9 = vsel %vm404_vm7, %v739_v42, %v745_v33 }
 0x5f8   :  { %v708_v45 = vadd.f32 %v707_v35, %v706_v23  ;;  %v740_v51 = vunpack.c.l.b16 %v720_v34 }
 0x5fa   :  { %v721_v29 = vpack.c.bf16 %v708_v45, %v708_v45  ;;  %v931_v55 = vsel %vm408_vm9, %v708_v45, %v930_v52  ;;  %v747_v47 = vsel %vm406_vm8, %v740_v51, %v746_v9 }
 0x5fb   :  { %933 = vst.msk [vmem:[%s1520_s13] sm:$0xff] %vm329_vm2, %v931_v55 }
 0x5fc   :  { %v741_v46 = vunpack.c.l.b16 %v721_v29 }
 0x5fe   :  { %v748_v10 = vsel %vm408_vm9, %v741_v46, %v747_v47 }
 0x5ff   :  { %v749_v11 = vpack.c.b16 %v748_v10, %v748_v10 }
 0x601   :  { %1070 = vmatmul.mubr.msk.bf16.vlgmr.msra.gmra.mrb[0].mxu1 %vm329_vm2, %v749_v11 }
 0x602   :  { %1074 = vmatpush3.bf16.msra.mxu1 %v1104_v49  ;;  %1077 = vmatprep.mubr.msk.bf16.mxu1 %vm1135_vm0, %v1134_v0 }
 0x603   :  { %1075 = vmatprep.subr.bf16.mxu1 %v1134_v0 }
 0x606   :  { %1076 = vmatpush3.bf16.msra.mxu1 %v1105_v53 }
 0x609   :  { %1078 = vmatmul.mubr.msk.bf16.vlgmr.msra.gmra.mrb[4].mxu1 %vm329_vm2, %v807_v18 }
 0x6d4   :  { %v799_v36 = vpop.f32.mrb[0].mxu1 }
 0x6d5   :  { %v1071_v41 = vpop.f32.mrb[1].mxu1 }
 0x6d6   :  { %v802_v43 = vpop.f32.mrb[2].mxu1 }
 0x6d7   :  { %v1072_v22 = vpop.f32.mrb[3].mxu1 }
 0x6dc   :  { %v857_v56 = vpop.f32.mrb[4].mxu1 }
 0x6dd   :  { %v858_v58 = vadd.f32 %v857_v56, %v799_v36  ;;  %v1079_v59 = vpop.f32.mrb[5].mxu1 }
 0x6de   :  { %v860_v61 = vpop.f32.mrb[6].mxu1 }
 0x6df   :  { %v870_v60 = vadd.f32 %v1034_v57, %v858_v58  ;;  %v1080_v62 = vpop.f32.mrb[7].mxu1 }
 0x6e1   :  { %1132 = vtanh.f32 %v870_v60 }
 0x6eb   :  { %v1133_v63 = vpop.eup %1132 }
 0x6ec   :  { %934 = vst.msk [vmem:[#allocation2] sm:$0xff] %vm329_vm2, %v1133_v63 }
 0x6f3   :  { %v935_v0 = vld [vmem:[#allocation2] sm:$0xff] }
 0x6f4   :  { %v936_v1 = vpack.c.bf16 %v935_v0, %v935_v0 }
 0x6f6   :  { %1086 = vmatmul.mubr.msk.bf16.vlgmr.msra.gmra.mrb[4].mxu0 %vm329_vm2, %v936_v1 }
 0x7c9   :  { %v998_v3 = vpop.f32.mrb[4].mxu0 }
 0x7ca   :  { %v999_v4 = vadd.f32 %v1035_v2, %v998_v3  ;;  %v1087_v30 = vpop.f32.mrb[5].mxu0 }
 0x7cb   :  { %v1001_v48 = vpop.f32.mrb[6].mxu0 }
 0x7cc   :  { %1004 = vst [vmem:[%s1524_s10] sm:$0xff] %v999_v4  ;;  %v1088_v19 = vpop.f32.mrb[7].mxu0 }

</bundles_post_ra>
